<compile_context>
chip_gen: v6e
topology: v6e:2x2x1
jax: 0.10.0
libtpu: 0.0.40
codegen_flags: <defaults>
</compile_context>

<pallas_src>
import functools

import jax
import jax.numpy as jnp
import numpy as np
from jax.experimental import pallas as pl
from jax.experimental.pallas import tpu as pltpu


def _round_up(x, m):
    return ((x + m - 1) // m) * m


def _pick_h4_chunk(h4, max_chunk=2048):
    """Largest multiple-of-128 divisor of h4 that is <= max_chunk (else h4)."""
    if h4 <= max_chunk:
        return h4
    c = max_chunk - (max_chunk % 128)
    while c >= 128:
        if h4 % c == 0:
            return c
        c -= 128
    return h4


def _default_vmem_limit():
    """Chip-aware VMEM budget (v7x has 64 MiB/TC, v5e/v6e have 128 MiB)."""
    cap = None
    try:
        cap = getattr(pltpu.get_tpu_info(), "vmem_capacity_bytes", None)
    except Exception:
        cap = None
    if not cap:
        cap = 64 * 1024 * 1024          # conservative fallback (fits every gen)
    return int(min(int(cap * 0.75), 100 * 1024 * 1024))


def moe_expert_kernel(te_ref, tv_ref, x_ref, wt_ref, w1_ref, b1_ref,
                      w2_ref, b2_ref, o_ref, *, ck):
    """One grid step = one token tile, routed to exactly one expert."""
    t = pl.program_id(0)
    h4 = w1_ref.shape[-1]
    n_chunks = h4 // ck

    @pl.when(tv_ref[t] != 0)
    def _compute():
        x = x_ref[...]                                       # (tn, H)
        acc = jnp.zeros(o_ref.shape, jnp.float32)            # (tn, H) f32 acc
        for c in range(n_chunks):                            # static 4H chunks
            lo = c * ck
            h = jnp.dot(x, w1_ref[0, :, lo:lo + ck],
                        preferred_element_type=jnp.float32)  # (tn, ck)
            h = h + b1_ref[0, :, lo:lo + ck]                 # + (1, ck)
            h = h * jax.nn.sigmoid(h)                        # SiLU
            acc = acc + jnp.dot(h.astype(w2_ref.dtype),
                                w2_ref[0, lo:lo + ck, :],
                                preferred_element_type=jnp.float32)
        y = acc + b2_ref[0, :, :]                            # (tn, H) + (1, H)
        # Per-assignment gate weight (zero on padded rows -> exact zeros).
        o_ref[...] = (wt_ref[...] * y).astype(o_ref.dtype)

    @pl.when(tv_ref[t] == 0)
    def _zero():
        # Fully-padded tile: skip the MLP, but the output block must still be
        # written (zeros) because the wrapper scatter-adds every output row.
        o_ref[...] = jnp.zeros_like(o_ref)


def moe_pallas(xt, top_idx, top_w, w1, b1, w2, b2, *, tn=256,
               compute_dtype=None, vmem_limit_bytes=None):
    """Grouped-routing MoE expert compute.

    xt:       (N, H) tokens
    top_idx:  (N, K) selected expert per token
    top_w:    (N, K) gate weight per selection (softmax over the K picks)
    w1,b1,w2,b2: stacked expert params (E,H,4H), (E,4H), (E,4H,H), (E,H)
    """
    N, H = xt.shape
    E, _, H4 = w1.shape
    K = top_idx.shape[1]
    A = N * K                                   # total routed assignments
    out_dtype = xt.dtype

    # Tile size: multiple of 8 (f32 sublane tiling), capped for tiny problems.
    tn = int(tn)
    tn = max(8, min((tn // 8) * 8, _round_up(A, 8)))

    # Static grid bound: sum_e ceil(count_e/tn) <= ceil(A/tn) + E. Round to an
    # even tile count so v7x's two TensorCores get equal shares.
    n_tiles = -(-A // tn) + E
    if n_tiles % 2:
        n_tiles += 1
    a_pad = n_tiles * tn

    # ---- routing layout (plain-JAX glue) ----
    expert_flat = top_idx.reshape(A).astype(jnp.int32)                # (A,)
    weight_flat = top_w.reshape(A).astype(out_dtype)                  # (A,)
    token_flat = jnp.repeat(jnp.arange(N, dtype=jnp.int32), K)        # (A,)

    order = jnp.argsort(expert_flat)
    sorted_expert = expert_flat[order]
    sorted_token = token_flat[order]
    sorted_weight = weight_flat[order]

    counts = jnp.bincount(expert_flat, length=E).astype(jnp.int32)    # (E,)
    padded_counts = ((counts + tn - 1) // tn) * tn                    # tile-aligned
    padded_cum = jnp.cumsum(padded_counts)
    group_start_pad = padded_cum - padded_counts                      # exclusive
    group_start_sorted = jnp.cumsum(counts) - counts

    rank = jnp.arange(A, dtype=jnp.int32) - group_start_sorted[sorted_expert]
    dest = group_start_pad[sorted_expert] + rank                      # (A,)

    x_pad = jnp.zeros((a_pad, H), xt.dtype).at[dest].set(xt[sorted_token])
    wt_pad = jnp.zeros((a_pad, 1), out_dtype).at[dest].set(sorted_weight[:, None])
    tok_pad = jnp.zeros((a_pad,), jnp.int32).at[dest].set(sorted_token)

    tile_start = jnp.arange(n_tiles, dtype=jnp.int32) * tn
    tile_expert = jnp.sum(tile_start[:, None] >= padded_cum[None, :],
                          axis=1).astype(jnp.int32)
    tile_expert = jnp.minimum(tile_expert, E - 1)
    # A tile is "real" iff it contains at least one non-padded assignment.
    tile_valid = ((tile_start - group_start_pad[tile_expert])
                  < counts[tile_expert]).astype(jnp.int32)

    # Optional reduced-precision MXU operands (keep f32 accumulation/bias).
    # TODO(synk): default to bfloat16 (v6e/v7x) / fp8 weights (v7x) for
    # production shapes; kept f32 here to match the f32 reference exactly.
    if compute_dtype is not None:
        x_pad = x_pad.astype(compute_dtype)
        w1 = w1.astype(compute_dtype)
        w2 = w2.astype(compute_dtype)

    b1r = b1.reshape(E, 1, H4)
    b2r = b2.reshape(E, 1, H)
    ck = _pick_h4_chunk(H4)

    if vmem_limit_bytes is None:
        vmem_limit_bytes = _default_vmem_limit()

    # TODO(synk): for very large H (whole-expert weight block > VMEM budget),
    # add a grid axis tiling H4 (streamed weight slabs + resident accumulator).
    grid_spec = pltpu.PrefetchScalarGridSpec(
        num_scalar_prefetch=2,
        grid=(n_tiles,),
        in_specs=[
            pl.BlockSpec((tn, H), lambda t, te, tv: (t, 0)),            # tokens
            pl.BlockSpec((tn, 1), lambda t, te, tv: (t, 0)),            # gate w
            pl.BlockSpec((1, H, H4), lambda t, te, tv: (te[t], 0, 0)),  # w1[e]
            pl.BlockSpec((1, 1, H4), lambda t, te, tv: (te[t], 0, 0)),  # b1[e]
            pl.BlockSpec((1, H4, H), lambda t, te, tv: (te[t], 0, 0)),  # w2[e]
            pl.BlockSpec((1, 1, H), lambda t, te, tv: (te[t], 0, 0)),   # b2[e]
        ],
        out_specs=pl.BlockSpec((tn, H), lambda t, te, tv: (t, 0)),
    )

    out_pad = pl.pallas_call(
        functools.partial(moe_expert_kernel, ck=ck),
        out_shape=jax.ShapeDtypeStruct((a_pad, H), out_dtype),
        grid_spec=grid_spec,
        compiler_params=pltpu.CompilerParams(
            dimension_semantics=("parallel",),
            vmem_limit_bytes=int(vmem_limit_bytes)),
    )(tile_expert, tile_valid, x_pad, wt_pad, w1, b1r, w2, b2r)

    # Combine the (already gate-weighted) per-assignment outputs per token.
    # Padded rows carry exact zeros, so scattering them to token 0 is harmless.
    out = jnp.zeros((N, H), out_dtype).at[tok_pad].add(out_pad)
    return out


def moe_forward(x, params, *, top_k=2, tn=256, compute_dtype=None):
    """x: (B, T, H) float32.  Returns (B, T, H).  Matches MoELayer.forward."""
    wg, bg, w1, b1, w2, b2 = params
    B, T, H = x.shape
    xt = x.reshape(B * T, H)

    # --- gate (tiny; plain JAX): logits -> top-k -> softmax over top-k ---
    logits = xt @ wg.T + bg                              # (N, E)
    top_vals, top_idx = jax.lax.top_k(logits, top_k)     # (N, K)
    top_w = jax.nn.softmax(top_vals, axis=-1)            # (N, K)

    out = moe_pallas(xt, top_idx, top_w, w1, b1, w2, b2,
                     tn=tn, compute_dtype=compute_dtype)
    return out.reshape(B, T, H)


def moe_reference(x, params, *, top_k=2):
    """Pure-JAX transcription of the PyTorch forward, for verification."""
    wg, bg, w1, b1, w2, b2 = params
    B, T, H = x.shape
    E = wg.shape[0]
    xt = x.reshape(B * T, H)
    logits = xt @ wg.T + bg
    top_vals, top_idx = jax.lax.top_k(logits, top_k)
    weights = jax.nn.softmax(top_vals, axis=-1)
    out = jnp.zeros_like(xt)
    for i in range(top_k):
        mask = jax.nn.one_hot(top_idx[:, i], E, dtype=xt.dtype)  # (N, E)
        eo = jnp.zeros_like(xt)
        for j in range(E):
            h = xt @ w1[j] + b1[j]
            h = h * jax.nn.sigmoid(h)
            y = h @ w2[j] + b2[j]
            eo = eo + mask[:, j:j + 1] * y
        out = out + eo * weights[:, i:i + 1]
    return out.reshape(B, T, H)


def init_params(key, hidden, expert_num):
    h4 = hidden * 4
    ks = jax.random.split(key, 6)
    scale_in = 1.0 / np.sqrt(hidden)
    scale_h4 = 1.0 / np.sqrt(h4)
    wg = jax.random.normal(ks[0], (expert_num, hidden), jnp.float32) * scale_in
    bg = jax.random.normal(ks[1], (expert_num,), jnp.float32) * 0.01
    w1 = jax.random.normal(ks[2], (expert_num, hidden, h4), jnp.float32) * scale_in
    b1 = jax.random.normal(ks[3], (expert_num, h4), jnp.float32) * 0.01
    w2 = jax.random.normal(ks[4], (expert_num, h4, hidden), jnp.float32) * scale_h4
    b2 = jax.random.normal(ks[5], (expert_num, hidden), jnp.float32) * 0.01
    return wg, bg, w1, b1, w2, b2


if __name__ == "__main__":
    B, T, H = 2, 8, 32          # N = B*T = 16 tokens, hidden = 32, 4H = 128
    E, TOP_K = 8, 2

    key = jax.random.PRNGKey(0)
    kx, kp = jax.random.split(key)
    x = jax.random.normal(kx, (B, T, H), jnp.float32)
    params = init_params(kp, H, E)

    out = moe_forward(x, params, top_k=TOP_K, tn=256)
    out = jax.block_until_ready(out)

    ref = jax.block_until_ready(moe_reference(x, params, top_k=TOP_K))
    assert out.shape == (B, T, H)
    np.testing.assert_allclose(np.asarray(out), np.asarray(ref),
                               rtol=1e-5, atol=1e-5)
    print("KERNEL_OK")
</pallas_src>

<mosaic_0001>
module attributes {stable_mosaic.version = 11 : i64} {
  func.func @moe_expert_kernel(%arg0: i32, %arg1: memref<10xi32, #tpu.memory_space<smem>>, %arg2: memref<10xi32, #tpu.memory_space<smem>>, %arg3: memref<32x32xf32, #tpu.memory_space<vmem>>, %arg4: memref<32x1xf32, #tpu.memory_space<vmem>>, %arg5: memref<1x32x128xf32, #tpu.memory_space<vmem>>, %arg6: memref<1x1x128xf32, #tpu.memory_space<vmem>>, %arg7: memref<1x128x32xf32, #tpu.memory_space<vmem>>, %arg8: memref<1x1x32xf32, #tpu.memory_space<vmem>>, %arg9: memref<32x32xf32, #tpu.memory_space<vmem>>) attributes {dimension_semantics = [#tpu.dimension_semantics<parallel>], iteration_bounds = array<i64: 10>, scalar_prefetch = 2 : i64, scratch_operands = 0 : i64, tpu.core_type = #tpu.core_type<tc>, window_params = [{transform_indices = @transform_0, window_bounds = array<i64: 32, 32>}, {transform_indices = @transform_1, window_bounds = array<i64: 32, 1>}, {transform_indices = @transform_2, window_bounds = array<i64: 1, 32, 128>}, {transform_indices = @transform_3, window_bounds = array<i64: 1, 1, 128>}, {transform_indices = @transform_4, window_bounds = array<i64: 1, 128, 32>}, {transform_indices = @transform_5, window_bounds = array<i64: 1, 1, 32>}, {transform_indices = @transform_6, window_bounds = array<i64: 32, 32>}]} {
    %0 = arith.index_cast %arg0 : i32 to index
    %1 = memref.load %arg2[%0] : memref<10xi32, #tpu.memory_space<smem>>
    %c0_i32 = arith.constant 0 : i32
    %2 = arith.cmpi ne, %1, %c0_i32 : i32
    %3 = arith.extui %2 : i1 to i32
    %c0_i32_0 = arith.constant 0 : i32
    %4 = arith.cmpi ne, %3, %c0_i32_0 : i32
    scf.if %4 {
      %c0 = arith.constant 0 : index
      %c0_3 = arith.constant 0 : index
      %10 = vector.load %arg3[%c0, %c0_3] : memref<32x32xf32, #tpu.memory_space<vmem>>, vector<32x32xf32>
      %cst = arith.constant 0.000000e+00 : f32
      %11 = vector.broadcast %cst : f32 to vector<32x32xf32>
      %c0_4 = arith.constant 0 : index
      %c0_5 = arith.constant 0 : index
      %c0_6 = arith.constant 0 : index
      %12 = vector.load %arg5[%c0_4, %c0_5, %c0_6] : memref<1x32x128xf32, #tpu.memory_space<vmem>>, vector<1x32x128xf32>
      %13 = vector.shape_cast %12 : vector<1x32x128xf32> to vector<32x128xf32>
      %cst_7 = arith.constant dense<0.000000e+00> : vector<32x128xf32>
      %14 = tpu.matmul %10, %13, %cst_7 {dimension_numbers = #tpu.dot_dimension_numbers<[1], [0], [0], [1], [0, 0, 1, 1], [], []>} : vector<32x32xf32>, vector<32x128xf32>, vector<32x128xf32> -> vector<32x128xf32>
      %c0_8 = arith.constant 0 : index
      %c0_9 = arith.constant 0 : index
      %c0_10 = arith.constant 0 : index
      %15 = vector.load %arg6[%c0_8, %c0_9, %c0_10] : memref<1x1x128xf32, #tpu.memory_space<vmem>>, vector<1x1x128xf32>
      %16 = vector.shape_cast %15 : vector<1x1x128xf32> to vector<1x128xf32>
      %17 = vector.broadcast %16 : vector<1x128xf32> to vector<32x128xf32>
      %18 = arith.addf %14, %17 : vector<32x128xf32>
      %19 = arith.negf %18 : vector<32x128xf32>
      %20 = math.exp %19 : vector<32x128xf32>
      %cst_11 = arith.constant 1.000000e+00 : f32
      %21 = vector.broadcast %cst_11 : f32 to vector<32x128xf32>
      %22 = arith.addf %21, %20 : vector<32x128xf32>
      %23 = arith.divf %21, %22 : vector<32x128xf32>
      %24 = arith.mulf %18, %23 : vector<32x128xf32>
      %c0_12 = arith.constant 0 : index
      %c0_13 = arith.constant 0 : index
      %c0_14 = arith.constant 0 : index
      %25 = vector.load %arg7[%c0_12, %c0_13, %c0_14] : memref<1x128x32xf32, #tpu.memory_space<vmem>>, vector<1x128x32xf32>
      %26 = vector.shape_cast %25 : vector<1x128x32xf32> to vector<128x32xf32>
      %cst_15 = arith.constant dense<0.000000e+00> : vector<32x32xf32>
      %27 = tpu.matmul %24, %26, %cst_15 {dimension_numbers = #tpu.dot_dimension_numbers<[1], [0], [0], [1], [0, 0, 1, 1], [], []>} : vector<32x128xf32>, vector<128x32xf32>, vector<32x32xf32> -> vector<32x32xf32>
      %28 = arith.addf %11, %27 : vector<32x32xf32>
      %c0_16 = arith.constant 0 : index
      %c0_17 = arith.constant 0 : index
      %c0_18 = arith.constant 0 : index
      %29 = vector.load %arg8[%c0_16, %c0_17, %c0_18] : memref<1x1x32xf32, #tpu.memory_space<vmem>>, vector<1x1x32xf32>
      %30 = vector.shape_cast %29 : vector<1x1x32xf32> to vector<1x32xf32>
      %31 = vector.broadcast %30 : vector<1x32xf32> to vector<32x32xf32>
      %32 = arith.addf %28, %31 : vector<32x32xf32>
      %c0_19 = arith.constant 0 : index
      %c0_20 = arith.constant 0 : index
      %33 = vector.load %arg4[%c0_19, %c0_20] : memref<32x1xf32, #tpu.memory_space<vmem>>, vector<32x1xf32>
      %34 = vector.broadcast %33 : vector<32x1xf32> to vector<32x32xf32>
      %35 = arith.mulf %34, %32 : vector<32x32xf32>
      %c0_21 = arith.constant 0 : index
      %c0_22 = arith.constant 0 : index
      %36 = vector.load %arg9[%c0_21, %c0_22] : memref<32x32xf32, #tpu.memory_space<vmem>>, vector<32x32xf32>
      tpu.vector_store %arg9[%c0_21, %c0_22], %35 {strides = array<i32>} : memref<32x32xf32, #tpu.memory_space<vmem>>, vector<32x32xf32>,
    } else {
    }
    %5 = arith.index_cast %arg0 : i32 to index
    %6 = memref.load %arg2[%5] : memref<10xi32, #tpu.memory_space<smem>>
    %c0_i32_1 = arith.constant 0 : i32
    %7 = arith.cmpi eq, %6, %c0_i32_1 : i32
    %8 = arith.extui %7 : i1 to i32
    %c0_i32_2 = arith.constant 0 : i32
    %9 = arith.cmpi ne, %8, %c0_i32_2 : i32
    scf.if %9 {
      %cst = arith.constant 0.000000e+00 : f32
      %10 = vector.broadcast %cst : f32 to vector<32x32xf32>
      %c0 = arith.constant 0 : index
      %c0_3 = arith.constant 0 : index
      %11 = vector.load %arg9[%c0, %c0_3] : memref<32x32xf32, #tpu.memory_space<vmem>>, vector<32x32xf32>
      tpu.vector_store %arg9[%c0, %c0_3], %10 {strides = array<i32>} : memref<32x32xf32, #tpu.memory_space<vmem>>, vector<32x32xf32>,
    } else {
    }
    return
  }
  func.func @transform_0(%arg0: i32, %arg1: memref<10xi32, #tpu.memory_space<smem>>, %arg2: memref<10xi32, #tpu.memory_space<smem>>) -> (i32, i32) {
    %c0_i32 = arith.constant 0 : i32
    %c0_i32_0 = arith.constant 0 : i32
    return %arg0, %c0_i32 : i32, i32
  }
  func.func @transform_1(%arg0: i32, %arg1: memref<10xi32, #tpu.memory_space<smem>>, %arg2: memref<10xi32, #tpu.memory_space<smem>>) -> (i32, i32) {
    %c0_i32 = arith.constant 0 : i32
    %c0_i32_0 = arith.constant 0 : i32
    return %arg0, %c0_i32 : i32, i32
  }
  func.func @transform_2(%arg0: i32, %arg1: memref<10xi32, #tpu.memory_space<smem>>, %arg2: memref<10xi32, #tpu.memory_space<smem>>) -> (i32, i32, i32) {
    %0 = arith.index_cast %arg0 : i32 to index
    %1 = memref.load %arg1[%0] : memref<10xi32, #tpu.memory_space<smem>>
    %c0_i32 = arith.constant 0 : i32
    %c0_i32_0 = arith.constant 0 : i32
    %c0_i32_1 = arith.constant 0 : i32
    return %1, %c0_i32, %c0_i32_0 : i32, i32, i32
  }
  func.func @transform_3(%arg0: i32, %arg1: memref<10xi32, #tpu.memory_space<smem>>, %arg2: memref<10xi32, #tpu.memory_space<smem>>) -> (i32, i32, i32) {
    %0 = arith.index_cast %arg0 : i32 to index
    %1 = memref.load %arg1[%0] : memref<10xi32, #tpu.memory_space<smem>>
    %c0_i32 = arith.constant 0 : i32
    %c0_i32_0 = arith.constant 0 : i32
    %c0_i32_1 = arith.constant 0 : i32
    return %1, %c0_i32, %c0_i32_0 : i32, i32, i32
  }
  func.func @transform_4(%arg0: i32, %arg1: memref<10xi32, #tpu.memory_space<smem>>, %arg2: memref<10xi32, #tpu.memory_space<smem>>) -> (i32, i32, i32) {
    %0 = arith.index_cast %arg0 : i32 to index
    %1 = memref.load %arg1[%0] : memref<10xi32, #tpu.memory_space<smem>>
    %c0_i32 = arith.constant 0 : i32
    %c0_i32_0 = arith.constant 0 : i32
    %c0_i32_1 = arith.constant 0 : i32
    return %1, %c0_i32, %c0_i32_0 : i32, i32, i32
  }
  func.func @transform_5(%arg0: i32, %arg1: memref<10xi32, #tpu.memory_space<smem>>, %arg2: memref<10xi32, #tpu.memory_space<smem>>) -> (i32, i32, i32) {
    %0 = arith.index_cast %arg0 : i32 to index
    %1 = memref.load %arg1[%0] : memref<10xi32, #tpu.memory_space<smem>>
    %c0_i32 = arith.constant 0 : i32
    %c0_i32_0 = arith.constant 0 : i32
    %c0_i32_1 = arith.constant 0 : i32
    return %1, %c0_i32, %c0_i32_0 : i32, i32, i32
  }
  func.func @transform_6(%arg0: i32, %arg1: memref<10xi32, #tpu.memory_space<smem>>, %arg2: memref<10xi32, #tpu.memory_space<smem>>) -> (i32, i32) {
    %c0_i32 = arith.constant 0 : i32
    %c0_i32_0 = arith.constant 0 : i32
    return %arg0, %c0_i32 : i32, i32
  }
}

</mosaic_0001>

<bundles_post_ra>
// kernel: tpu_custom_call.1
= control target key start
LH: loop header
LB: loop body
LE: loop exit
PB: predicated region body
PF: predicated region fallthrough
CT: control target
= control target key end

     0   :  { %s1126_s0 = inlined_call_operand.vmem [shape: s32[10], index: 0, kind: input, shape index: {}]   ;;  %s1127_s2 = inlined_call_operand.vmem [shape: f32[320,32], index: 2, kind: input, shape index: {}]   ;;  %s1128_s3 = inlined_call_operand.vmem [shape: f32[320,1], index: 3, kind: input, shape index: {}]   ;;  %s1129_s4 = inlined_call_operand.vmem [shape: f32[8,32,128], index: 4, kind: input, shape index: {}]   ;;  %s1130_s5 = inlined_call_operand.vmem [shape: f32[8,1,128], index: 5, kind: input, shape index: {}]   ;;  %s1131_s6 = inlined_call_operand.vmem [shape: f32[8,128,32], index: 6, kind: input, shape index: {}]   ;;  %s1132_s7 = inlined_call_operand.vmem [shape: f32[8,1,32], index: 7, kind: input, shape index: {}]   ;;  %s1133_s8 = inlined_call_operand.vmem [shape: f32[320,32], index: 8, kind: output, shape index: {}]   ;;  %s1134_s1 = inlined_call_operand.vmem [shape: s32[10], index: 1, kind: input, shape index: {}]  }
   0x1   :  { %s13_s29 = sshll.u32 %s1126_s0, 4  ;;  %s17_s10 = sshll.u32 %s1134_s1, 4  ;;  %s14_s29 = int_to_ptr.vmem [resolvable:$true] %s13_s29  ;;  %s18_s10 = int_to_ptr.vmem [resolvable:$true] %s17_s10 }
   0x2   :  { %s932_s11 = scalar_lea.vmem %s14_s29, 16  ;;  %p937_p1 = scmp.lt.s32.totalorder %s14_s29, %s14_s29 }
   0x3   :  { %p933_p0 = scmp.ne.s32.totalorder %s14_s29, %s932_s11  ;;  %p938_p2 = scmp.lt.s32.totalorder %s932_s11, %s932_s11 }
   0x5   :  { %p939_p3 = por %p938_p2, %p937_p1 }
   0x7   :  { %p940_p4 = pnand %p939_p3, %p933_p0 }
   0x9   :  { %943 = shalt.err (!%p940_p4)  }
   0xa   :  { %s966_s12 = smov [#allocation3]   ;;  %s944_s13 = scalar_lea.vmem %s18_s10, 16 }
   0xb   :  { %16 = dma.vmem_to_smem %s14_s29, 16, %s966_s12, [#allocation2] }
   0xc   :  { %p945_p5 = scmp.ne.s32.totalorder %s18_s10, %s944_s13  ;;  %p949_p6 = scmp.lt.s32.totalorder %s18_s10, %s18_s10 }
   0xd   :  { %p950_p7 = scmp.lt.s32.totalorder %s944_s13, %s944_s13 }
   0xf   :  { %p951_p8 = por %p950_p7, %p949_p6 }
  0x11   :  { %p952_p9 = pnand %p951_p8, %p945_p5 }
  0x13   :  { %955 = shalt.err (!%p952_p9)  }
  0x14   :  { %s967_s0 = smov [#allocation4]  }
  0x15   :  { %20 = dma.vmem_to_smem %s18_s10, 16, %s967_s0, [#allocation2] }
  0x16   :  { %960 = dma.done.wait [#allocation2], 32 }
  0x17   :  { %961 = vsyncadd [#allocation2], 4294967264 }
  0x18   :  { %22 = sfence }
  0x19   :  { %s1021_s1 = smov 0  }
  0x1a LB: > { %s1027_s14 = sadd.s32 4294967295, %s964_s1   ;;  %p795_p10 = scmp.ge.s32.totalorder %s964_s1, 1  ;;  %s964_s1 = sphi %s1021_s1, %s28_s1  }
  0x1b   : > { %p288_p11 = scmp.lt.s32.totalorder %s964_s1, 11 }
  0x1d   : > { %p289_p12 = pnand %p795_p10, %p288_p11 }
  0x1e   : > { %s796_s15 = sshll.u32 (!%p289_p12), %s1027_s14, 2  ;;  %s355_s16 = sld [smem:[#allocation3 + %s1027_s14]] (!%p289_p12) }
  0x1f   : > { %292 = sbr.rel (%p289_p12) target bundleno = 514 (0x202), region = 44  ;;  %p344_p13 = scmp.lt.s32.totalorder (!%p289_p12), %s796_s15, 39 }
  0x20   : > { %s362_s17 = sld [smem:[#allocation3 + %s1027_s14]] (!%p289_p12) }
  0x21   : > { %s367_s18 = sld [smem:[#allocation3 + %s1027_s14]] (!%p289_p12) }
  0x22   : > { %s374_s19 = sld [smem:[#allocation3 + %s1027_s14]] (!%p289_p12) }
  0x23   : > { %s385_s21 = sld [smem:[#allocation4 + %s1027_s14]] (!%p289_p12) }
  0x24   : > { %s1136_s15 = smov (!%p344_p13, %s796_s15), 39  ;;  %p356_p0 = scmp.lt.s32.totalorder %s355_s16, 7 }
  0x25   : > { %s797_s20 = sshll.u32 %s1136_s15, 3 }
  0x26   : > { %s1040_s24 = scalar_lea.vmem %s1127_s2, %s797_s20  ;;  %s1045_s27 = scalar_lea.vmem %s1128_s3, %s797_s20 }
  0x27   : > { %p363_p1 = scmp.lt.s32.totalorder %s362_s17, 7  ;;  %p368_p2 = scmp.lt.s32.totalorder %s367_s18, 7 }
  0x28   : > { %s1050_s30 = scalar_lea.vmem %s1133_s8, %s797_s20  ;;  %s1138_s16 = smov (!%p356_p0, %s355_s16), 7 }
  0x29   : > { %s1140_s17 = smov (!%p363_p1, %s362_s17), 7  ;;  %s820_s9 = sshll.u32 %s1138_s16, 5 }
  0x2a   : > { %p375_p3 = scmp.lt.s32.totalorder %s374_s19, 7  ;;  %s360_s12 = scalar_lea.vmem %s1129_s4, %s820_s9 }
  0x2b   : > { %s365_s15 = scalar_lea.vmem %s1130_s5, %s1140_s17  ;;  %s1142_s18 = smov (!%p368_p2, %s367_s18), 7 }
  0x2c   : > { %s1144_s19 = smov (!%p375_p3, %s374_s19), 7  ;;  %s821_s20 = sshll.u32 %s1142_s18, 7 }
  0x2d   : > { %s1066_s25 = scalar_lea.vmem %s1131_s6, %s821_s20  ;;  %s377_s28 = scalar_lea.vmem %s1132_s7, %s1144_s19 }
  0x2e   : > { %p806_p4 = scmp.eq.s32.totalorder %s385_s21, 0 }
  0x30   : > { %389 = sbr.rel (%p806_p4) target bundleno = 498 (0x1f2), region = 48 }
  0x35   : > { %v397_v0 = vld [vmem:[%s360_s12 + $0x18] sm:$0xff]  ;;  %v396_v1 = vld [vmem:[%s360_s12 + $0x10] sm:$0xff]  ;;  %vm405_vm0 = vcmask 261120   ;;  %v390_v2 = vld [vmem:[%s1040_s24] sm:$0xff]  ;;  %v968_v26 = vmov 0  }
  0x36   : > { %850 = vmatprep.subr.mxu0 %v397_v0  ;;  %v395_v3 = vld [vmem:[%s360_s12 + $0x8] sm:$0xff]  ;;  %858 = vmatprep.mubr.msk.f32.mxu0 %vm405_vm0, %v390_v2  ;;  %v394_v4 = vld [vmem:[%s360_s12] sm:$0xff]  ;;  %v392_v6 = vld [vmem:[%s1040_s24 + $0x10] sm:$0xff] }
  0x37   : > { %851 = vmatpush3.msra.mxu0 %v397_v0  ;;  %v391_v5 = vld [vmem:[%s1040_s24 + $0x8] sm:$0xff]  ;;  %v393_v7 = vld [vmem:[%s1040_s24 + $0x18] sm:$0xff]  ;;  %v545_v9 = vld [vmem:[%s1066_s25 + $0x70] sm:$0xff]  ;;  %914 = vset.pattern.permute.xlu0 %v968_v26 }
  0x38   : > { %852 = vmatprep.subr.mxu0 %v396_v1  ;;  %v546_v8 = vld [vmem:[%s1066_s25 + $0x78] sm:$0xff]  ;;  %v544_v10 = vld [vmem:[%s1066_s25 + $0x68] sm:$0xff]  ;;  %v543_v11 = vld [vmem:[%s1066_s25 + $0x60] sm:$0xff]  ;;  %915 = vset.pattern.permute.xlu1 %v968_v26 }
  0x39   : > { %853 = vmatpush3.msra.mxu0 %v396_v1  ;;  %864 = vmatprep.subr.mxu1 %v546_v8  ;;  %v542_v12 = vld [vmem:[%s1066_s25 + $0x58] sm:$0xff]  ;;  %v541_v13 = vld [vmem:[%s1066_s25 + $0x50] sm:$0xff]  ;;  %v540_v14 = vld [vmem:[%s1066_s25 + $0x48] sm:$0xff] }
  0x3a   : > { %854 = vmatprep.subr.mxu0 %v395_v3  ;;  %865 = vmatpush3.msra.mxu1 %v546_v8  ;;  %v539_v15 = vld [vmem:[%s1066_s25 + $0x40] sm:$0xff]  ;;  %v538_v16 = vld [vmem:[%s1066_s25 + $0x38] sm:$0xff]  ;;  %v537_v17 = vld [vmem:[%s1066_s25 + $0x30] sm:$0xff] }
  0x3b   : > { %855 = vmatpush3.msra.mxu0 %v395_v3  ;;  %866 = vmatprep.subr.mxu1 %v545_v9  ;;  %v536_v18 = vld [vmem:[%s1066_s25 + $0x28] sm:$0xff]  ;;  %v535_v19 = vld [vmem:[%s1066_s25 + $0x20] sm:$0xff]  ;;  %v534_v20 = vld [vmem:[%s1066_s25 + $0x18] sm:$0xff] }
  0x3c   : > { %856 = vmatprep.subr.mxu0 %v394_v4  ;;  %867 = vmatpush3.msra.mxu1 %v545_v9  ;;  %v533_v21 = vld [vmem:[%s1066_s25 + $0x10] sm:$0xff]  ;;  %v532_v22 = vld [vmem:[%s1066_s25 + $0x8] sm:$0xff]  ;;  %v531_v23 = vld [vmem:[%s1066_s25] sm:$0xff] }
  0x3d   : > { %857 = vmatpush3.msra.mxu0 %v394_v4  ;;  %868 = vmatprep.subr.mxu1 %v544_v10  ;;  %v639_v24 = vld [vmem:[%s1045_s27] sm:$0xff]  ;;  %v641_v25 = vld [vmem:[%s1045_s27 + $0x10] sm:$0xff]  ;;  %v640_v27 = vld [vmem:[%s1045_s27 + $0x8] sm:$0xff] }
  0x3e   : > { %859 = vmatmul.mubr.msk.f32.vlgmr.msra.gmra.mxu0 %vm405_vm0, %v391_v5  ;;  %869 = vmatpush3.msra.mxu1 %v544_v10  ;;  %v642_v28 = vld [vmem:[%s1045_s27 + $0x18] sm:$0xff]  ;;  %v807_v29 = vld [vmem:[%s365_s15] ss:$0 sm:$0xff] }
  0x3f   : > { %861 = vmatprep.mubr.msk.f32.mxu0 %vm405_vm0, %v392_v6  ;;  %870 = vmatprep.subr.mxu1 %v543_v11  ;;  %v816_v59 = vld [vmem:[%s377_s28] ss:$0 sm:$0xff] }
  0x40   : > { %871 = vmatpush3.msra.mxu1 %v543_v11  ;;  %645 = vperm.xlu0 %914, %v639_v24  }
  0x41   : > { %872 = vmatprep.subr.mxu1 %v542_v12  ;;  %655 = vperm.xlu1 %915, %v641_v25  }
  0x42   : > { %862 = vmatmul.mubr.msk.f32.gmra.mxu0 %vm405_vm0, %v393_v7  ;;  %873 = vmatpush3.msra.mxu1 %v542_v12 }
  0x43   : > { %874 = vmatprep.subr.mxu1 %v541_v13 }
  0x44   : > { %875 = vmatpush3.msra.mxu1 %v541_v13  ;;  %650 = vperm.xlu0 %914, %v640_v27  }
  0x45   : > { %876 = vmatprep.subr.mxu1 %v540_v14  ;;  %660 = vperm.xlu1 %915, %v642_v28  }
  0x46   : > { %877 = vmatpush3.msra.mxu1 %v540_v14 }
  0x47   : > { %878 = vmatprep.subr.mxu1 %v539_v15 }
  0x48   : > { %879 = vmatpush3.msra.mxu1 %v539_v15 }
  0x49   : > { %880 = vmatprep.subr.mxu1 %v538_v16 }
  0x4a   : > { %881 = vmatpush3.msra.mxu1 %v538_v16 }
  0x4b   : > { %882 = vmatprep.subr.mxu1 %v537_v17 }
  0x4c   : > { %883 = vmatpush3.msra.mxu1 %v537_v17 }
  0x4d   : > { %884 = vmatprep.subr.mxu1 %v536_v18 }
  0x4e   : > { %885 = vmatpush3.msra.mxu1 %v536_v18 }
  0x4f   : > { %886 = vmatprep.subr.mxu1 %v535_v19 }
  0x50   : > { %887 = vmatpush3.msra.mxu1 %v535_v19 }
  0x51   : > { %888 = vmatprep.subr.mxu1 %v534_v20 }
  0x52   : > { %889 = vmatpush3.msra.mxu1 %v534_v20 }
  0x53   : > { %890 = vmatprep.subr.mxu1 %v533_v21 }
  0x54   : > { %891 = vmatpush3.msra.mxu1 %v533_v21 }
  0x55   : > { %892 = vmatprep.subr.mxu1 %v532_v22 }
  0x56   : > { %893 = vmatpush3.msra.mxu1 %v532_v22 }
  0x57   : > { %894 = vmatprep.subr.mxu1 %v531_v23 }
  0x58   : > { %895 = vmatpush3.msra.mxu1 %v531_v23 }
  0xbb   : > { %v646_v58 = vpop.permute.xlu0 %645 }
  0xbc   : > { %v656_v60 = vpop.permute.xlu1 %655 }
  0xbf   : > { %v651_v62 = vpop.permute.xlu0 %650 }
  0xc0   : > { %v661_v6 = vpop.permute.xlu1 %660 }
  0xfe   : > { %v860_v30 = vpop.f32.mrf.mxu0 }
  0xff   : > { %v490_v31 = vadd.f32 %v860_v30, %v807_v29 }
 0x100   : > { %v484_v32 = vpop.f32.mrf.mxu0 }
 0x101   : > { %v813_v33 = vmul.f32 -1.442695, %v490_v31  ;;  %v485_v34 = vadd.f32 %v807_v29, %v484_v32 }
 0x102   : > { %v863_v35 = vpop.f32.mrf.mxu0 }
 0x103   : > { %916 = vpow2.f32 %v813_v33  ;;  %v812_v36 = vmul.f32 -1.442695, %v485_v34  ;;  %v500_v37 = vadd.f32 %v863_v35, %v807_v29 }
 0x104   : > { %v494_v38 = vpop.f32.mrf.mxu0 }
 0x105   : > { %918 = vpow2.f32 %v812_v36  ;;  %v815_v39 = vmul.f32 -1.442695, %v500_v37  ;;  %v495_v40 = vadd.f32 %v807_v29, %v494_v38 }
 0x107   : > { %920 = vpow2.f32 %v815_v39  ;;  %v814_v41 = vmul.f32 -1.442695, %v495_v40 }
 0x109   : > { %922 = vpow2.f32 %v814_v41 }
 0x110   : > { %v917_v42 = vpop.eup %916 }
 0x111   : > { %v516_v43 = vadd.f32 1.0, %v917_v42 }
 0x112   : > { %v919_v44 = vpop.eup %918 }
 0x113   : > { %v515_v45 = vadd.f32 1.0, %v919_v44  ;;  %924 = vrcp.f32 %v516_v43 }
 0x114   : > { %v921_v46 = vpop.eup %920 }
 0x115   : > { %926 = vrcp.f32 %v515_v45  ;;  %v518_v47 = vadd.f32 1.0, %v921_v46 }
 0x116   : > { %v923_v48 = vpop.eup %922 }
 0x117   : > { %v517_v49 = vadd.f32 1.0, %v923_v48  ;;  %928 = vrcp.f32 %v518_v47 }
 0x119   : > { %930 = vrcp.f32 %v517_v49 }
 0x120   : > { %v925_v50 = vpop.eup %924 }
 0x121   : > { %v528_v53 = vmul.f32 %v925_v50, %v490_v31 }
 0x122   : > { %v927_v51 = vpop.eup %926 }
 0x123   : > { %v527_v52 = vmul.f32 %v927_v51, %v485_v34 }
 0x124   : > { %v929_v54 = vpop.eup %928 }
 0x125   : > { %896 = vmatprep.mubr.f32.mxu1 %v527_v52  ;;  %v530_v57 = vmul.f32 %v929_v54, %v500_v37 }
 0x126   : > { %v931_v55 = vpop.eup %930  ;;  %897 = vmatmul.mubr.f32.vlgmr.msra.gmra.mxu1 %v528_v53 }
 0x127   : > { %v529_v56 = vmul.f32 %v931_v55, %v495_v40 }
 0x129   : > { %899 = vmatprep.mubr.f32.mxu1 %v529_v56 }
 0x12a   : > { %900 = vmatmul.mubr.f32.gmra.mxu1 %v530_v57 }
 0x1e6   : > { %v898_v61 = vpop.f32.mrf.mxu1 }
 0x1e7   : > { %v626_v63 = vadd.f32 %v898_v61, %v816_v59 }
 0x1e8   : > { %v620_v0 = vpop.f32.mrf.mxu1 }
 0x1e9   : > { %v664_v1 = vmul.f32 %v651_v62, %v626_v63  ;;  %v621_v2 = vadd.f32 %v816_v59, %v620_v0 }
 0x1ea   : > { %v901_v3 = vpop.f32.mrf.mxu1 }
 0x1eb   : > { %668 = vst.msk [vmem:[%s1050_s30 + $0x8] sm:$0xff] %vm405_vm0, %v664_v1  ;;  %v663_v4 = vmul.f32 %v646_v58, %v621_v2  ;;  %v636_v5 = vadd.f32 %v901_v3, %v816_v59 }
 0x1ec   : > { %v630_v7 = vpop.f32.mrf.mxu1 }
 0x1ed   : > { %667 = vst.msk [vmem:[%s1050_s30] sm:$0xff] %vm405_vm0, %v663_v4  ;;  %v666_v8 = vmul.f32 %v661_v6, %v636_v5  ;;  %v631_v9 = vadd.f32 %v816_v59, %v630_v7 }
 0x1ef   : > { %670 = vst.msk [vmem:[%s1050_s30 + $0x18] sm:$0xff] %vm405_vm0, %v666_v8  ;;  %v665_v10 = vmul.f32 %v656_v60, %v631_v9 }
 0x1f1   : > { %669 = vst.msk [vmem:[%s1050_s30 + $0x10] sm:$0xff] %vm405_vm0, %v665_v10 }
 0x1f2 PF: > { %s671_s19 = sld [smem:[#allocation4 + %s1027_s14]] }
 0x1f8   : > { %p817_p5 = scmp.ne.s32.totalorder %s671_s19, 0 }
 0x1fa   : > { %675 = sbr.rel (%p817_p5) target bundleno = 514 (0x202), region = 52 }
 0x1ff   : > { %vm676_vm1 = vcmask 261120   ;;  %v969_v11 = vmov 0.0  }
 0x200   : > { %677 = vst.msk [vmem:[%s1050_s30] sm:$0xff] %vm676_vm1, %v969_v11  ;;  %678 = vst.msk [vmem:[%s1050_s30 + $0x8] sm:$0xff] %vm676_vm1, %v969_v11 }
 0x201   : > { %679 = vst.msk [vmem:[%s1050_s30 + $0x10] sm:$0xff] %vm676_vm1, %v969_v11  ;;  %680 = vst.msk [vmem:[%s1050_s30 + $0x18] sm:$0xff] %vm676_vm1, %v969_v11 }
 0x202 PF: > { %s28_s1 = sadd.s32 1, %s964_s1  }
 0x203   : > { %p25_p6 = scmp.ge.s32.totalorder %s28_s1, 12  }
 0x205   :  { %27 = sbr.rel (!%p25_p6) target bundleno = 26 (0x1a), region = 97 }

</bundles_post_ra>
